<compile_context>
chip_gen: v6e
topology: v6e:2x2x1
jax: 0.10.0
libtpu: 0.0.40
codegen_flags: <defaults>
</compile_context>

<pallas_src>
import jax
import jax.numpy as jnp
from jax.experimental import pallas as pl
from jax.experimental.pallas import tpu as pltpu

D_IN, D_H1, D_H2, D_OUT = 784, 128, 64, 10
OUT_PAD = 128          # lane-dense padded output width
NEG_BIG = -1e30        # kills padded output lanes through softmax (exp -> 0)


def mlp_kernel(x_ref, w1_ref, b1_ref, w2_ref, b2_ref, w3_ref, b3_ref, o_ref):
    # Cast to the matmul dtype here (VPU cast is hidden under the x DMA),
    # instead of a separate XLA cast kernel over HBM in the wrapper.
    x = x_ref[...].astype(w1_ref.dtype)                                 # [TB, 784]

    # fc1 + ReLU  (MXU matmul in bf16, f32 accumulate; elementwise in f32)
    h1 = jnp.dot(x, w1_ref[...], preferred_element_type=jnp.float32)   # [TB, 128]
    h1 = jnp.maximum(h1 + b1_ref[...], 0.0)

    # fc2 + ReLU
    h2 = jnp.dot(h1.astype(w2_ref.dtype), w2_ref[...],
                 preferred_element_type=jnp.float32)                   # [TB, 64]
    h2 = jnp.maximum(h2 + b2_ref[...], 0.0)

    # output layer, padded to 128 lanes (padded W3 cols are 0, padded b3 lanes
    # are -1e30; bias add + softmax stay in f32 so exp(-1e30) == 0 exactly)
    logits = jnp.dot(h2.astype(w3_ref.dtype), w3_ref[...],
                     preferred_element_type=jnp.float32)               # [TB, 128]
    logits = logits + b3_ref[...]

    # numerically-stable softmax over the feature axis (PyTorch dim=1)
    m = jnp.max(logits, axis=-1, keepdims=True)
    e = jnp.exp(logits - m)
    denom = jnp.sum(e, axis=-1, keepdims=True)
    o_ref[...] = (e * pl.reciprocal(denom, approx=True)).astype(o_ref.dtype)


def _round_up(n, m):
    return ((n + m - 1) // m) * m


def _pick_tile(batch, tile_b):
    """Clamp the batch tile to the batch; keep >=2 grid steps for big batches
    so the 'parallel' axis can shard across both v7x TensorCores."""
    b8 = _round_up(batch, 8)
    tb = min(tile_b, b8)
    if b8 >= 512 and pl.cdiv(b8, tb) < 2:
        tb = _round_up(pl.cdiv(b8, 2), 8)
    return tb


def network_forward(x, params, *, tile_b=2048, use_bf16=True,
                    out_dtype=jnp.bfloat16, return_padded=False):
    """x: [B, 784] float32. params: dict of w1,b1,w2,b2,w3,b3 (f32).

    Returns [B, 10] float32 softmax probabilities (or the raw [B, 128]
    lane-dense slab in `out_dtype` if return_padded=True).
    """
    B, d_in = x.shape
    assert d_in == D_IN
    mm_dtype = jnp.bfloat16 if use_bf16 else jnp.float32

    # --- weights: matmul operands in bf16, biases in f32 ---
    w1 = params["w1"].astype(mm_dtype)                    # [784, 128]
    w2 = params["w2"].astype(mm_dtype)                    # [128,  64]
    b1 = params["b1"].astype(jnp.float32).reshape(1, D_H1)
    b2 = params["b2"].astype(jnp.float32).reshape(1, D_H2)
    # lane-dense padded output head
    w3p = jnp.zeros((D_H2, OUT_PAD), jnp.float32).at[:, :D_OUT].set(
        params["w3"]).astype(mm_dtype)                    # [64, 128]
    b3p = jnp.full((1, OUT_PAD), NEG_BIG, jnp.float32).at[:, :D_OUT].set(
        params["b3"].astype(jnp.float32).reshape(1, D_OUT))   # [1, 128]

    # --- batch tiling: no jnp.pad; cdiv grid + masked partial last block ---
    tb = _pick_tile(B, tile_b)
    grid = (pl.cdiv(B, tb),)

    # Weights/biases are tiny: keep them fully resident (same block every step).
    full = lambda a: pl.BlockSpec(a.shape, lambda i: (0,) * a.ndim)

    out = pl.pallas_call(
        mlp_kernel,
        out_shape=jax.ShapeDtypeStruct((B, OUT_PAD), out_dtype),
        grid_spec=pltpu.PrefetchScalarGridSpec(
            num_scalar_prefetch=0,
            grid=grid,
            in_specs=[
                pl.BlockSpec((tb, D_IN), lambda i: (i, 0)),   # x tile over batch
                full(w1), full(b1),
                full(w2), full(b2),
                full(w3p), full(b3p),
            ],
            out_specs=pl.BlockSpec((tb, OUT_PAD), lambda i: (i, 0)),
        ),
        compiler_params=pltpu.CompilerParams(
            dimension_semantics=("parallel",),
            vmem_limit_bytes=48 * 1024 * 1024,
        ),
    )(x, w1, b1, w2, b2, w3p, b3p)

    if return_padded:
        return out
    # tiny slice on [B, 10]; avoids carrying the padded slab downstream
    return out[:, :D_OUT].astype(jnp.float32)


def init_params(key):
    """Deterministic init mimicking PyTorch Linear default (U[-1/sqrt(fan_in), +])."""
    def linear(k, fan_in, fan_out):
        kw, kb = jax.random.split(k)
        bound = 1.0 / jnp.sqrt(fan_in)
        w = jax.random.uniform(kw, (fan_in, fan_out), jnp.float32, -bound, bound)
        b = jax.random.uniform(kb, (1, fan_out), jnp.float32, -bound, bound)
        return w, b

    k1, k2, k3 = jax.random.split(key, 3)
    w1, b1 = linear(k1, D_IN, D_H1)
    w2, b2 = linear(k2, D_H1, D_H2)
    w3, b3 = linear(k3, D_H2, D_OUT)
    return dict(w1=w1, b1=b1, w2=w2, b2=b2, w3=w3, b3=b3)


def reference_forward(x, p):
    h1 = jax.nn.relu(x @ p["w1"] + p["b1"])
    h2 = jax.nn.relu(h1 @ p["w2"] + p["b2"])
    return jax.nn.softmax(h2 @ p["w3"] + p["b3"], axis=1)


if __name__ == "__main__":
    key = jax.random.PRNGKey(0)
    kx1, kx2, kp = jax.random.split(key, 3)
    params = init_params(kp)

    # --- small batch (single tile) ---
    B = 32
    x = jax.random.normal(kx1, (B, 784), jnp.float32)
    out = jax.block_until_ready(network_forward(x, params))
    ref = reference_forward(x, params)
    assert out.shape == (B, 10)
    # bf16 matmul inputs + bf16 output slab + approx reciprocal -> loose tol
    assert jnp.allclose(out, ref, atol=3e-2, rtol=3e-2), float(jnp.max(jnp.abs(out - ref)))
    assert jnp.allclose(jnp.sum(out, axis=1), jnp.ones((B,)), atol=2e-2)

    # --- ragged batch: exercises multi-tile grid + masked partial last block ---
    B2 = 300
    x2 = jax.random.normal(kx2, (B2, 784), jnp.float32)
    out2 = jax.block_until_ready(network_forward(x2, params, tile_b=128))
    ref2 = reference_forward(x2, params)
    assert out2.shape == (B2, 10)
    assert jnp.allclose(out2, ref2, atol=3e-2, rtol=3e-2)
    assert jnp.allclose(jnp.sum(out2, axis=1), jnp.ones((B2,)), atol=2e-2)

    print("KERNEL_OK")
</pallas_src>

<mosaic_0001>
module attributes {stable_mosaic.version = 11 : i64} {
  func.func @mlp_kernel(%arg0: i32, %arg1: memref<32x784xf32, #tpu.memory_space<vmem>>, %arg2: memref<784x128xbf16, #tpu.memory_space<vmem>>, %arg3: memref<1x128xf32, #tpu.memory_space<vmem>>, %arg4: memref<128x64xbf16, #tpu.memory_space<vmem>>, %arg5: memref<1x64xf32, #tpu.memory_space<vmem>>, %arg6: memref<64x128xbf16, #tpu.memory_space<vmem>>, %arg7: memref<1x128xf32, #tpu.memory_space<vmem>>, %arg8: memref<32x128xbf16, #tpu.memory_space<vmem>>) attributes {dimension_semantics = [#tpu.dimension_semantics<parallel>], iteration_bounds = array<i64: 1>, scalar_prefetch = 0 : i64, scratch_operands = 0 : i64, tpu.core_type = #tpu.core_type<tc>, window_params = [{transform_indices = @transform_0, window_bounds = array<i64: 32, 784>}, {pipeline_mode = #tpu.pipeline_mode<synchronous>, transform_indices = @transform_1, window_bounds = array<i64: 784, 128>}, {pipeline_mode = #tpu.pipeline_mode<synchronous>, transform_indices = @transform_2, window_bounds = array<i64: 1, 128>}, {pipeline_mode = #tpu.pipeline_mode<synchronous>, transform_indices = @transform_3, window_bounds = array<i64: 128, 64>}, {pipeline_mode = #tpu.pipeline_mode<synchronous>, transform_indices = @transform_4, window_bounds = array<i64: 1, 64>}, {pipeline_mode = #tpu.pipeline_mode<synchronous>, transform_indices = @transform_5, window_bounds = array<i64: 64, 128>}, {pipeline_mode = #tpu.pipeline_mode<synchronous>, transform_indices = @transform_6, window_bounds = array<i64: 1, 128>}, {transform_indices = @transform_7, window_bounds = array<i64: 32, 128>}]} {
    %c0 = arith.constant 0 : index
    %c0_0 = arith.constant 0 : index
    %0 = vector.load %arg1[%c0, %c0_0] : memref<32x784xf32, #tpu.memory_space<vmem>>, vector<32x784xf32>
    %1 = arith.truncf %0 : vector<32x784xf32> to vector<32x784xbf16>
    %c0_1 = arith.constant 0 : index
    %c0_2 = arith.constant 0 : index
    %2 = vector.load %arg2[%c0_1, %c0_2] : memref<784x128xbf16, #tpu.memory_space<vmem>>, vector<784x128xbf16>
    %cst = arith.constant dense<0.000000e+00> : vector<32x128xf32>
    %3 = tpu.matmul %1, %2, %cst {dimension_numbers = #tpu.dot_dimension_numbers<[1], [0], [0], [1], [0, 0, 1, 1], [], []>} : vector<32x784xbf16>, vector<784x128xbf16>, vector<32x128xf32> -> vector<32x128xf32>
    %c0_3 = arith.constant 0 : index
    %c0_4 = arith.constant 0 : index
    %4 = vector.load %arg3[%c0_3, %c0_4] : memref<1x128xf32, #tpu.memory_space<vmem>>, vector<1x128xf32>
    %5 = vector.broadcast %4 : vector<1x128xf32> to vector<32x128xf32>
    %6 = arith.addf %3, %5 : vector<32x128xf32>
    %cst_5 = arith.constant 0.000000e+00 : f32
    %7 = vector.broadcast %cst_5 : f32 to vector<32x128xf32>
    %8 = arith.maximumf %6, %7 : vector<32x128xf32>
    %9 = arith.truncf %8 : vector<32x128xf32> to vector<32x128xbf16>
    %c0_6 = arith.constant 0 : index
    %c0_7 = arith.constant 0 : index
    %10 = vector.load %arg4[%c0_6, %c0_7] : memref<128x64xbf16, #tpu.memory_space<vmem>>, vector<128x64xbf16>
    %cst_8 = arith.constant dense<0.000000e+00> : vector<32x64xf32>
    %11 = tpu.matmul %9, %10, %cst_8 {dimension_numbers = #tpu.dot_dimension_numbers<[1], [0], [0], [1], [0, 0, 1, 1], [], []>} : vector<32x128xbf16>, vector<128x64xbf16>, vector<32x64xf32> -> vector<32x64xf32>
    %c0_9 = arith.constant 0 : index
    %c0_10 = arith.constant 0 : index
    %12 = vector.load %arg5[%c0_9, %c0_10] : memref<1x64xf32, #tpu.memory_space<vmem>>, vector<1x64xf32>
    %13 = vector.broadcast %12 : vector<1x64xf32> to vector<32x64xf32>
    %14 = arith.addf %11, %13 : vector<32x64xf32>
    %cst_11 = arith.constant 0.000000e+00 : f32
    %15 = vector.broadcast %cst_11 : f32 to vector<32x64xf32>
    %16 = arith.maximumf %14, %15 : vector<32x64xf32>
    %17 = arith.truncf %16 : vector<32x64xf32> to vector<32x64xbf16>
    %c0_12 = arith.constant 0 : index
    %c0_13 = arith.constant 0 : index
    %18 = vector.load %arg6[%c0_12, %c0_13] : memref<64x128xbf16, #tpu.memory_space<vmem>>, vector<64x128xbf16>
    %cst_14 = arith.constant dense<0.000000e+00> : vector<32x128xf32>
    %19 = tpu.matmul %17, %18, %cst_14 {dimension_numbers = #tpu.dot_dimension_numbers<[1], [0], [0], [1], [0, 0, 1, 1], [], []>} : vector<32x64xbf16>, vector<64x128xbf16>, vector<32x128xf32> -> vector<32x128xf32>
    %c0_15 = arith.constant 0 : index
    %c0_16 = arith.constant 0 : index
    %20 = vector.load %arg7[%c0_15, %c0_16] : memref<1x128xf32, #tpu.memory_space<vmem>>, vector<1x128xf32>
    %21 = vector.broadcast %20 : vector<1x128xf32> to vector<32x128xf32>
    %22 = arith.addf %19, %21 : vector<32x128xf32>
    %cst_17 = arith.constant dense<0xFF800000> : vector<32xf32>
    %23 = vector.multi_reduction <maximumf>, %22, %cst_17 [1] : vector<32x128xf32> to vector<32xf32>
    %24 = vector.shape_cast %23 : vector<32xf32> to vector<32x1xf32>
    %25 = vector.broadcast %24 : vector<32x1xf32> to vector<32x128xf32>
    %26 = arith.subf %22, %25 : vector<32x128xf32>
    %27 = math.exp %26 : vector<32x128xf32>
    %cst_18 = arith.constant dense<0.000000e+00> : vector<32xf32>
    %28 = vector.multi_reduction <add>, %27, %cst_18 [1] : vector<32x128xf32> to vector<32xf32>
    %29 = vector.shape_cast %28 : vector<32xf32> to vector<32x1xf32>
    %30 = tpu.reciprocal %29 {approx = true} : vector<32x1xf32> -> vector<32x1xf32>
    %31 = vector.broadcast %30 : vector<32x1xf32> to vector<32x128xf32>
    %32 = arith.mulf %27, %31 : vector<32x128xf32>
    %33 = arith.truncf %32 : vector<32x128xf32> to vector<32x128xbf16>
    %c0_19 = arith.constant 0 : index
    %c0_20 = arith.constant 0 : index
    %34 = vector.load %arg8[%c0_19, %c0_20] : memref<32x128xbf16, #tpu.memory_space<vmem>>, vector<32x128xbf16>
    tpu.vector_store %arg8[%c0_19, %c0_20], %33 {strides = array<i32>} : memref<32x128xbf16, #tpu.memory_space<vmem>>, vector<32x128xbf16>,
    return
  }
  func.func @transform_0(%arg0: i32) -> (i32, i32) {
    %c0_i32 = arith.constant 0 : i32
    %c0_i32_0 = arith.constant 0 : i32
    return %arg0, %c0_i32 : i32, i32
  }
  func.func @transform_1(%arg0: i32) -> (i32, i32) {
    %c0_i32 = arith.constant 0 : i32
    %c0_i32_0 = arith.constant 0 : i32
    %c0_i32_1 = arith.constant 0 : i32
    return %c0_i32, %c0_i32_0 : i32, i32
  }
  func.func @transform_2(%arg0: i32) -> (i32, i32) {
    %c0_i32 = arith.constant 0 : i32
    %c0_i32_0 = arith.constant 0 : i32
    %c0_i32_1 = arith.constant 0 : i32
    return %c0_i32, %c0_i32_0 : i32, i32
  }
  func.func @transform_3(%arg0: i32) -> (i32, i32) {
    %c0_i32 = arith.constant 0 : i32
    %c0_i32_0 = arith.constant 0 : i32
    %c0_i32_1 = arith.constant 0 : i32
    return %c0_i32, %c0_i32_0 : i32, i32
  }
  func.func @transform_4(%arg0: i32) -> (i32, i32) {
    %c0_i32 = arith.constant 0 : i32
    %c0_i32_0 = arith.constant 0 : i32
    %c0_i32_1 = arith.constant 0 : i32
    return %c0_i32, %c0_i32_0 : i32, i32
  }
  func.func @transform_5(%arg0: i32) -> (i32, i32) {
    %c0_i32 = arith.constant 0 : i32
    %c0_i32_0 = arith.constant 0 : i32
    %c0_i32_1 = arith.constant 0 : i32
    return %c0_i32, %c0_i32_0 : i32, i32
  }
  func.func @transform_6(%arg0: i32) -> (i32, i32) {
    %c0_i32 = arith.constant 0 : i32
    %c0_i32_0 = arith.constant 0 : i32
    %c0_i32_1 = arith.constant 0 : i32
    return %c0_i32, %c0_i32_0 : i32, i32
  }
  func.func @transform_7(%arg0: i32) -> (i32, i32) {
    %c0_i32 = arith.constant 0 : i32
    %c0_i32_0 = arith.constant 0 : i32
    return %arg0, %c0_i32 : i32, i32
  }
}

</mosaic_0001>

<bundles_post_ra>
// kernel: tpu_custom_call.1
= control target key start
LH: loop header
LB: loop body
LE: loop exit
PB: predicated region body
PF: predicated region fallthrough
CT: control target
= control target key end

     0   :  { %12 = vsyncpa [#allocation3], 0  ;;  %s1486_s0 = inlined_call_operand.hbm [shape: f32[32,784], index: 0, kind: input, shape index: {}]   ;;  %s1487_s1 = inlined_call_operand.hbm [shape: bf16[784,128], index: 1, kind: input, shape index: {}]   ;;  %s1488_s2 = inlined_call_operand.vmem [shape: f32[1,128], index: 2, kind: input, shape index: {}]   ;;  %s1489_s3 = inlined_call_operand.vmem [shape: bf16[128,64], index: 3, kind: input, shape index: {}]   ;;  %s1490_s4 = inlined_call_operand.vmem [shape: f32[1,64], index: 4, kind: input, shape index: {}]   ;;  %s1491_s5 = inlined_call_operand.vmem [shape: bf16[64,128], index: 5, kind: input, shape index: {}]   ;;  %s1492_s6 = inlined_call_operand.vmem [shape: f32[1,128], index: 6, kind: input, shape index: {}]   ;;  %s1493_s7 = inlined_call_operand.hbm [shape: bf16[32,128], index: 7, kind: output, shape index: {}]  }
   0x1   :  { %13 = vsyncpa [#allocation6], 0 }
   0x2   :  { %14 = vsyncpa [#allocation4], 0  ;;  %s1379_s24 = smov [#allocation2]  }
   0x3   :  { %s20_s25 = sshll.u32 %s1379_s24, 4  ;;  %s21_s25 = int_to_ptr.vmem [resolvable:$true] %s20_s25 }
   0x4   :  { %s1321_s26 = scalar_lea.vmem %s21_s25, 3584  ;;  %p1326_p1 = scmp.lt.s32.totalorder %s21_s25, %s21_s25 }
   0x5   :  { %p1322_p0 = scmp.ne.s32.totalorder %s21_s25, %s1321_s26  ;;  %p1327_p2 = scmp.lt.s32.totalorder %s1321_s26, %s1321_s26 }
   0x7   :  { %p1328_p3 = por %p1327_p2, %p1326_p1 }
   0x9   :  { %p1329_p4 = pnand %p1328_p3, %p1322_p0 }
   0xb   :  { %1332 = shalt.err (!%p1329_p4)
}
   0xc   :  { %s1380_s27 = smov 896   ;;  %s1381_s28 = smov 56  }
   0xd   :  { %26 = dma.hbm_to_vmem [thread:$0]  %s1486_s0, 3584, %s21_s25, [#allocation3], %s1380_s27, %s1380_s27, %s1381_s28  }
   0xe   :  { %s1382_s8 = smov [#allocation5]  }
   0xf   :  { %s32_s9 = sshll.u32 %s1382_s8, 4  ;;  %s33_s9 = int_to_ptr.vmem [resolvable:$true] %s32_s9 }
  0x10   :  { %s1341_s10 = scalar_lea.vmem %s33_s9, 6272  ;;  %p1346_p6 = scmp.lt.s32.totalorder %s33_s9, %s33_s9 }
  0x11   :  { %p1342_p5 = scmp.ne.s32.totalorder %s33_s9, %s1341_s10  ;;  %p1347_p7 = scmp.lt.s32.totalorder %s1341_s10, %s1341_s10 }
  0x13   :  { %p1348_p8 = por %p1347_p7, %p1346_p6 }
  0x15   :  { %p1349_p9 = pnand %p1348_p8, %p1342_p5 }
  0x17   :  { %1352 = shalt.err (!%p1349_p9)
}
  0x18   :  { %s1383_s11 = smov 64   ;;  %s1384_s12 = smov 4  }
  0x19   :  { %38 = dma.hbm_to_vmem [thread:$0]  %s1487_s1, 6272, %s33_s9, [#allocation6], %s1383_s11, %s1383_s11, %s1384_s12  }
  0x1a   :  { %1373 = dma.done.wait [#allocation3], 3584  }
  0x1b   :  { %1374 = vsyncadd [#allocation3], 4294963712 }
  0x1c   :  { %1375 = dma.done.wait [#allocation6], 6272  }
  0x1d   :  { %1376 = vsyncadd [#allocation6], 4294961024  ;;  %v1236_v0 = vld [vmem:[#allocation5 + $0x78] sm:$0xff]   ;;  %v1240_v4 = vld [vmem:[#allocation5 + $0x70] sm:$0xff]   ;;  %vm497_vm0 = vcmask 130048   ;;  %vm871_vm1 = vcmask 523264  }
  0x1e   :  { %v1237_v1 = vld [vmem:[#allocation5 + $0x38] sm:$0xff]   ;;  %1088 = vmatprep.subr.bf16.mxu0 %v1236_v0  ;;  %v1241_v5 = vld [vmem:[#allocation5 + $0x30] sm:$0xff]   ;;  %v1244_v8 = vld [vmem:[#allocation5 + $0x68] sm:$0xff]  }
  0x1f   :  { %v1238_v2 = vld [vmem:[#allocation5 + $0xf8] sm:$0xff]   ;;  %1089 = vmatpush3.bf16.msra.mxu0 %v1237_v1  ;;  %v1242_v6 = vld [vmem:[#allocation5 + $0xf0] sm:$0xff]   ;;  %v1245_v9 = vld [vmem:[#allocation5 + $0x28] sm:$0xff]  }
  0x20   :  { %v1239_v3 = vld [vmem:[#allocation5 + $0xb8] sm:$0xff]   ;;  %1116 = vmatprep.subr.bf16.mxu1 %v1238_v2  ;;  %1090 = vmatprep.subr.bf16.mxu0 %v1240_v4  ;;  %v1243_v7 = vld [vmem:[#allocation5 + $0xb0] sm:$0xff]   ;;  %v1246_v10 = vld [vmem:[#allocation5 + $0xe8] sm:$0xff]  }
  0x21   :  { %1117 = vmatpush3.bf16.msra.mxu1 %v1239_v3  ;;  %v1247_v11 = vld [vmem:[#allocation5 + $0xa8] sm:$0xff]   ;;  %v1248_v12 = vld [vmem:[#allocation5 + $0x60] sm:$0xff]   ;;  %v1252_v16 = vld [vmem:[#allocation5 + $0x58] sm:$0xff]  }
  0x22   :  { %1118 = vmatprep.subr.bf16.mxu1 %v1242_v6  ;;  %v1249_v13 = vld [vmem:[#allocation5 + $0x20] sm:$0xff]   ;;  %v1253_v17 = vld [vmem:[#allocation5 + $0x18] sm:$0xff]   ;;  %v1256_v20 = vld [vmem:[#allocation5 + $0x50] sm:$0xff]  }
  0x23   :  { %1091 = vmatpush3.bf16.msra.mxu0 %v1241_v5  ;;  %v1250_v14 = vld [vmem:[#allocation5 + $0xe0] sm:$0xff]   ;;  %v1254_v18 = vld [vmem:[#allocation5 + $0xd8] sm:$0xff]   ;;  %v1257_v21 = vld [vmem:[#allocation5 + $0x10] sm:$0xff]  }
  0x24   :  { %1092 = vmatprep.subr.bf16.mxu0 %v1244_v8  ;;  %v1251_v15 = vld [vmem:[#allocation5 + $0xa0] sm:$0xff]   ;;  %v1255_v19 = vld [vmem:[#allocation5 + $0x98] sm:$0xff]   ;;  %v1258_v22 = vld [vmem:[#allocation5 + $0xd0] sm:$0xff]  }
  0x25   :  { %1119 = vmatpush3.bf16.msra.mxu1 %v1243_v7  ;;  %v1259_v23 = vld [vmem:[#allocation5 + $0x90] sm:$0xff]   ;;  %v1260_v24 = vld [vmem:[#allocation5 + $0x48] sm:$0xff]   ;;  %v1264_v28 = vld [vmem:[#allocation5 + $0x40] sm:$0xff]  }
  0x26   :  { %1120 = vmatprep.subr.bf16.mxu1 %v1246_v10  ;;  %v1261_v25 = vld [vmem:[#allocation5 + $0x8] sm:$0xff]   ;;  %v1265_v29 = vld [vmem:[#allocation5] sm:$0xff]   ;;  %v63_v36 = vld [vmem:[#allocation2 + $0x38] sm:$0xff] }
  0x27   :  { %1093 = vmatpush3.bf16.msra.mxu0 %v1245_v9  ;;  %v1262_v26 = vld [vmem:[#allocation5 + $0xc8] sm:$0xff]   ;;  %v1266_v30 = vld [vmem:[#allocation5 + $0xc0] sm:$0xff]   ;;  %v1268_v38 = vld [vmem:[#allocation5 + $0x178] sm:$0xff]  }
  0x28   :  { %1094 = vmatprep.subr.bf16.mxu0 %v1248_v12  ;;  %v1263_v27 = vld [vmem:[#allocation5 + $0x88] sm:$0xff]   ;;  %v64_v32 = vld [vmem:[#allocation2 + $0x40] sm:$0xff]  ;;  %v59_v39 = vld [vmem:[#allocation2 + $0x18] sm:$0xff] }
  0x29   :  { %1121 = vmatpush3.bf16.msra.mxu1 %v1247_v11  ;;  %v57_v31 = vld [vmem:[#allocation2 + $0x8] sm:$0xff]  ;;  %v1267_v34 = vld [vmem:[#allocation5 + $0x80] sm:$0xff]   ;;  %v66_v40 = vld [vmem:[#allocation2 + $0x50] sm:$0xff] }
  0x2a   :  { %1122 = vmatprep.subr.bf16.mxu1 %v1250_v14  ;;  %v85_v33 = vpack.c.bf16 %v64_v32, %v57_v31  ;;  %v56_v35 = vld [vmem:[#allocation2] sm:$0xff]  ;;  %v87_v41 = vpack.c.bf16 %v66_v40, %v59_v39  ;;  %v1269_v42 = vld [vmem:[#allocation5 + $0x138] sm:$0xff]   ;;  %v58_v43 = vld [vmem:[#allocation2 + $0x10] sm:$0xff] }
  0x2b   :  { %1095 = vmatpush3.bf16.msra.mxu0 %v1249_v13  ;;  %v84_v37 = vpack.c.bf16 %v63_v36, %v56_v35  ;;  %v65_v44 = vld [vmem:[#allocation2 + $0x48] sm:$0xff]  ;;  %v1270_v46 = vld [vmem:[#allocation5 + $0x170] sm:$0xff]   ;;  %v1274_v50 = vld [vmem:[#allocation5 + $0x160] sm:$0xff]  }
  0x2c   :  { %1096 = vmatprep.subr.bf16.mxu0 %v1252_v16  ;;  %536 = vmatprep.mubr.bf16.mxu0 %v85_v33  ;;  %v86_v45 = vpack.c.bf16 %v65_v44, %v58_v43  ;;  %v1271_v47 = vld [vmem:[#allocation5 + $0x130] sm:$0xff]   ;;  %v1272_v48 = vld [vmem:[#allocation5 + $0x168] sm:$0xff]   ;;  %v1275_v51 = vld [vmem:[#allocation5 + $0x120] sm:$0xff]  }
  0x2d   :  { %1123 = vmatpush3.bf16.msra.mxu1 %v1251_v15  ;;  %585 = vmatprep.mubr.bf16.mxu1 %v87_v41  ;;  %v1273_v49 = vld [vmem:[#allocation5 + $0x128] sm:$0xff]   ;;  %v71_v52 = vld [vmem:[#allocation2 + $0x78] sm:$0xff]  ;;  %v78_v53 = vld [vmem:[#allocation2 + $0xb0] sm:$0xff] }
  0x2e   :  { %1124 = vmatprep.subr.bf16.mxu1 %v1254_v18  ;;  %v1276_v54 = vld [vmem:[#allocation5 + $0x158] sm:$0xff]   ;;  %v92_v55 = vpack.c.bf16 %v78_v53, %v71_v52  ;;  %v70_v56 = vld [vmem:[#allocation2 + $0x70] sm:$0xff]  ;;  %v77_v57 = vld [vmem:[#allocation2 + $0xa8] sm:$0xff] }
  0x2f   :  { %1097 = vmatpush3.bf16.msra.mxu0 %v1253_v17  ;;  %v91_v58 = vpack.c.bf16 %v77_v57, %v70_v56  ;;  %v73_v59 = vld [vmem:[#allocation2 + $0x88] sm:$0xff]  ;;  %v80_v60 = vld [vmem:[#allocation2 + $0xc0] sm:$0xff]  ;;  %v79_v63 = vld [vmem:[#allocation2 + $0xb8] sm:$0xff] }
  0x30   :  { %1098 = vmatprep.subr.bf16.mxu0 %v1256_v20  ;;  %v72_v61 = vld [vmem:[#allocation2 + $0x80] sm:$0xff]  ;;  %v94_v62 = vpack.c.bf16 %v80_v60, %v73_v59  ;;  %v1277_v1 = vld [vmem:[#allocation5 + $0x118] sm:$0xff]   ;;  %v1278_v2 = vld [vmem:[#allocation5 + $0x150] sm:$0xff]  }
  0x31   :  { %1125 = vmatpush3.bf16.msra.mxu1 %v1255_v19  ;;  %v93_v0 = vpack.c.bf16 %v79_v63, %v72_v61  ;;  %v1282_v3 = vld [vmem:[#allocation5 + $0x180] sm:$0xff]   ;;  %v1279_v4 = vld [vmem:[#allocation5 + $0x110] sm:$0xff]   ;;  %v1280_v5 = vld [vmem:[#allocation5 + $0x148] sm:$0xff]  }
  0x32   :  { %1126 = vmatprep.subr.bf16.mxu1 %v1258_v22  ;;  %v61_v6 = vld [vmem:[#allocation2 + $0x28] sm:$0xff]  ;;  %v68_v7 = vld [vmem:[#allocation2 + $0x60] sm:$0xff]  ;;  %v62_v9 = vld [vmem:[#allocation2 + $0x30] sm:$0xff] }
  0x33   :  { %1099 = vmatpush3.bf16.msra.mxu0 %v1257_v21  ;;  %v89_v8 = vpack.c.bf16 %v68_v7, %v61_v6  ;;  %v69_v10 = vld [vmem:[#allocation2 + $0x68] sm:$0xff]  ;;  %v76_v11 = vld [vmem:[#allocation2 + $0xa0] sm:$0xff]  ;;  %v83_v12 = vld [vmem:[#allocation2 + $0xd8] sm:$0xff] }
  0x34   :  { %1100 = vmatprep.subr.bf16.mxu0 %v1260_v24  ;;  %v1281_v13 = vld [vmem:[#allocation5 + $0x108] sm:$0xff]   ;;  %v90_v14 = vpack.c.bf16 %v69_v10, %v62_v9  ;;  %v97_v15 = vpack.c.bf16 %v83_v12, %v76_v11  ;;  %v1283_v16 = vld [vmem:[#allocation5 + $0x140] sm:$0xff]   ;;  %v67_v19 = vld [vmem:[#allocation2 + $0x58] sm:$0xff] }
  0x35   :  { %1127 = vmatpush3.bf16.msra.mxu1 %v1259_v23  ;;  %v1284_v17 = vld [vmem:[#allocation5 + $0x100] sm:$0xff]   ;;  %v75_v20 = vld [vmem:[#allocation2 + $0x98] sm:$0xff]  ;;  %v82_v21 = vld [vmem:[#allocation2 + $0xd0] sm:$0xff] }
  0x36   :  { %1128 = vmatprep.subr.bf16.mxu1 %v1262_v26  ;;  %v60_v18 = vld [vmem:[#allocation2 + $0x20] sm:$0xff]  ;;  %v96_v23 = vpack.c.bf16 %v82_v21, %v75_v20  ;;  %v74_v24 = vld [vmem:[#allocation2 + $0x90] sm:$0xff]  ;;  %v1289_v31 = vld [vmem:[%s1489_s3 + $0x18] sm:$0xff]  }
  0x37   :  { %1101 = vmatpush3.bf16.msra.mxu0 %v1261_v25  ;;  %v88_v22 = vpack.c.bf16 %v67_v19, %v60_v18  ;;  %v81_v25 = vld [vmem:[#allocation2 + $0xc8] sm:$0xff]  ;;  %v1290_v32 = vld [vmem:[%s1489_s3 + $0x10] sm:$0xff]   ;;  %v1293_v35 = vld [vmem:[%s1491_s5 + $0x18] sm:$0xff]  }
  0x38   :  { %1102 = vmatprep.subr.bf16.mxu0 %v1264_v28  ;;  %v95_v26 = vpack.c.bf16 %v81_v25, %v74_v24  ;;  %v1286_v28 = vld [vmem:[%s1489_s3 + $0x30] sm:$0xff]   ;;  %v1291_v33 = vld [vmem:[%s1489_s3 + $0x8] sm:$0xff]   ;;  %v1001_v52 = vld [vmem:[%s1488_s2] ss:$0 sm:$0xff] }
  0x39   :  { %1129 = vmatpush3.bf16.msra.mxu1 %v1263_v27  ;;  %v1285_v27 = vld [vmem:[%s1489_s3 + $0x38] sm:$0xff]  }
  0x3a   :  { %1130 = vmatprep.subr.bf16.mxu1 %v1266_v30  ;;  %v1288_v30 = vld [vmem:[%s1489_s3 + $0x20] sm:$0xff]  }
  0x3b   :  { %1103 = vmatpush3.bf16.msra.mxu0 %v1265_v29  ;;  %v1287_v29 = vld [vmem:[%s1489_s3 + $0x28] sm:$0xff]  }
  0x3c   :  { %1144 = vmatprep.subr.bf16.mxu0 %v1268_v38 }
  0x3d   :  { %1131 = vmatpush3.bf16.msra.mxu1 %v1267_v34  ;;  %v1292_v34 = vld [vmem:[%s1489_s3] sm:$0xff]  }
  0x3e   :  { %537 = vmatmul.mubr.bf16.vlgmr.msra.gmra.mxu0 %v84_v37  ;;  %1191 = vmatprep.subr.bf16.mxu1 %v1282_v3 }
  0x3f   :  { %1145 = vmatpush3.bf16.msra.mxu0 %v1269_v42  ;;  %544 = vmatprep.mubr.bf16.mxu0 %v92_v55 }
  0x40   :  { %586 = vmatmul.mubr.bf16.vlgmr.msra.gmra.mxu1 %v86_v45  ;;  %1146 = vmatprep.subr.bf16.mxu0 %v1270_v46 }
  0x41   :  { %593 = vmatprep.mubr.bf16.mxu1 %v94_v62  ;;  %1192 = vmatpush3.bf16.msra.mxu1 %v1282_v3 }
  0x42   :  { %1197 = vmatprep.subr.bf16.mxu1 %v1285_v27 }
  0x43   :  { %1147 = vmatpush3.bf16.msra.mxu0 %v1271_v47 }
  0x44   :  { %1148 = vmatprep.subr.bf16.mxu0 %v1272_v48 }
  0x46   :  { %545 = vmatmul.mubr.bf16.gmra.mxu0 %v91_v58 }
  0x47   :  { %1149 = vmatpush3.bf16.msra.mxu0 %v1273_v49  ;;  %634 = vmatprep.mubr.bf16.mxu0 %v89_v8 }
  0x48   :  { %1150 = vmatprep.subr.bf16.mxu0 %v1274_v50  ;;  %594 = vmatmul.mubr.bf16.gmra.mxu1 %v93_v0 }
  0x49   :  { %1193 = vmatprep.mubr.msk.bf16.mxu1 %vm497_vm0, %v90_v14 }
  0x4b   :  { %1151 = vmatpush3.bf16.msra.mxu0 %v1275_v51 }
  0x4c   :  { %1152 = vmatprep.subr.bf16.mxu0 %v1276_v54 }
  0x4f   :  { %1153 = vmatpush3.bf16.msra.mxu0 %v1277_v1 }
  0x50   :  { %1154 = vmatprep.subr.bf16.mxu0 %v1278_v2  ;;  %1194 = vmatmul.mubr.msk.bf16.vlgmr.msra.gmra.mxu1 %vm497_vm0, %v97_v15 }
  0x51   :  { %1198 = vmatpush3.bf16.msra.mxu1 %v1285_v27 }
  0x52   :  { %1199 = vmatprep.subr.bf16.mxu1 %v1286_v28 }
  0x53   :  { %1155 = vmatpush3.bf16.msra.mxu0 %v1279_v4 }
  0x54   :  { %1156 = vmatprep.subr.bf16.mxu0 %v1280_v5 }
  0x55   :  { %1200 = vmatpush3.bf16.msra.mxu1 %v1286_v28 }
  0x56   :  { %1201 = vmatprep.subr.bf16.mxu1 %v1287_v29 }
  0x57   :  { %1157 = vmatpush3.bf16.msra.mxu0 %v1281_v13 }
  0x58   :  { %1158 = vmatprep.subr.bf16.mxu0 %v1283_v16 }
  0x59   :  { %1202 = vmatpush3.bf16.msra.mxu1 %v1287_v29 }
  0x5a   :  { %1203 = vmatprep.subr.bf16.mxu1 %v1288_v30 }
  0x5b   :  { %1159 = vmatpush3.bf16.msra.mxu0 %v1284_v17 }
  0x5c   :  { %1217 = vmatprep.subr.bf16.mxu0 %v1293_v35 }
  0x5d   :  { %1204 = vmatpush3.bf16.msra.mxu1 %v1288_v30 }
  0x5e   :  { %635 = vmatmul.mubr.bf16.vlgmr.msra.gmra.mxu0 %v88_v22  ;;  %1205 = vmatprep.subr.bf16.mxu1 %v1289_v31 }
  0x5f   :  { %642 = vmatprep.mubr.bf16.mxu0 %v96_v23  ;;  %1218 = vmatpush3.bf16.msra.mxu0 %v1293_v35  ;;  %v1294_v35 = vld [vmem:[%s1491_s5 + $0x10] sm:$0xff]  }
  0x60   :  { %1219 = vmatprep.subr.bf16.mxu0 %v1294_v35 }
  0x61   :  { %1206 = vmatpush3.bf16.msra.mxu1 %v1289_v31 }
  0x62   :  { %1207 = vmatprep.subr.bf16.mxu1 %v1290_v32 }
  0x63   :  { %1220 = vmatpush3.bf16.msra.mxu0 %v1294_v35 }
  0x65   :  { %1208 = vmatpush3.bf16.msra.mxu1 %v1290_v32 }
  0x66   :  { %643 = vmatmul.mubr.bf16.gmra.mxu0 %v95_v26  ;;  %1209 = vmatprep.subr.bf16.mxu1 %v1291_v33 }
  0x69   :  { %1210 = vmatpush3.bf16.msra.mxu1 %v1291_v33 }
  0x6a   :  { %1211 = vmatprep.subr.bf16.mxu1 %v1292_v34 }
  0x6d   :  { %1212 = vmatpush3.bf16.msra.mxu1 %v1292_v34 }
  0xfe   :  { %v1104_v37 = vpop.f32.mrf.mxu0 }
 0x100   :  { %v1132_v36 = vpop.f32.mrf.mxu1  ;;  %v1105_v39 = vpop.f32.mrf.mxu0 }
 0x101   :  { %v1106_v51 = vadd.f32 %v1105_v39, %v1104_v37  ;;  %v1296_v37 = vld [vmem:[%s1491_s5] sm:$0xff]  }
 0x102   :  { %v1133_v38 = vpop.f32.mrf.mxu1  ;;  %v1107_v41 = vpop.f32.mrf.mxu0 }
 0x103   :  { %v539_v55 = vadd.f32 %v1106_v51, %v1001_v52  ;;  %v1134_v56 = vadd.f32 %v1133_v38, %v1132_v36  ;;  %v1295_v36 = vld [vmem:[%s1491_s5 + $0x8] sm:$0xff]  }
 0x104   :  { %v1135_v40 = vpop.f32.mrf.mxu1  ;;  %v1108_v44 = vpop.f32.mrf.mxu0  ;;  %1221 = vmatprep.subr.bf16.mxu0 %v1295_v36 }
 0x105   :  { %v1109_v57 = vadd.f32 %v1108_v44, %v1107_v41  ;;  %v588_v62 = vadd.f32 %v1134_v56, %v539_v55  ;;  %1222 = vmatpush3.bf16.msra.mxu0 %v1295_v36 }
 0x106   :  { %v1136_v42 = vpop.f32.mrf.mxu1  ;;  %v1110_v45 = vpop.f32.mrf.mxu0  ;;  %1223 = vmatprep.subr.bf16.mxu0 %v1296_v37 }
 0x107   :  { %v542_v63 = vadd.f32 %v1109_v57, %v1001_v52  ;;  %v1137_v0 = vadd.f32 %v1136_v42, %v1135_v40  ;;  %v1053_v40 = vld [vmem:[%s1490_s4] ss:$0 sm:$0xff]  ;;  %s1385_s4 = smov [#allocation7]  }
 0x108   :  { %v1138_v43 = vpop.f32.mrf.mxu1  ;;  %v1111_v47 = vpop.f32.mrf.mxu0 }
 0x109   :  { %v1112_v60 = vadd.f32 %v1111_v47, %v1110_v45  ;;  %v591_v8 = vadd.f32 %v1137_v0, %v542_v63  ;;  %1224 = vmatpush3.bf16.msra.mxu0 %v1296_v37 }
 0x10a   :  { %v1139_v46 = vpop.f32.mrf.mxu1  ;;  %v1113_v49 = vpop.f32.mrf.mxu0 }
 0x10b   :  { %v547_v5 = vadd.f32 %v1112_v60, %v1001_v52  ;;  %v1140_v6 = vadd.f32 %v1139_v46, %v1138_v43 }
 0x10c   :  { %v1141_v48 = vpop.f32.mrf.mxu1  ;;  %v1114_v54 = vpop.f32.mrf.mxu0 }
 0x10d   :  { %v1115_v9 = vadd.f32 %v1114_v54, %v1113_v49  ;;  %v596_v15 = vadd.f32 %v1140_v6, %v547_v5 }
 0x10e   :  { %v1142_v50 = vpop.f32.mrf.mxu1 }
 0x10f   :  { %v550_v17 = vadd.f32 %v1115_v9, %v1001_v52  ;;  %v1143_v18 = vadd.f32 %v1142_v50, %v1141_v48 }
 0x110   :  { %v1195_v53 = vpop.f32.mrf.mxu1 }
 0x111   :  { %v599_v26 = vadd.f32 %v1143_v18, %v550_v17 }
 0x112   :  { %v685_v59 = vpop.f32.mrf.mxu1 }
 0x114   :  { %v1196_v3 = vpop.f32.mrf.mxu1 }
 0x116   :  { %v688_v12 = vpop.f32.mrf.mxu1 }
 0x11e   :  { %v1160_v58 = vpop.f32.mrf.mxu0 }
 0x120   :  { %v1161_v61 = vpop.f32.mrf.mxu0 }
 0x121   :  { %v1162_v1 = vadd.f32 %v1161_v61, %v1160_v58 }
 0x122   :  { %v1163_v2 = vpop.f32.mrf.mxu0 }
 0x123   :  { %v637_v4 = vadd.f32 %v1162_v1, %v588_v62 }
 0x124   :  { %v1164_v7 = vpop.f32.mrf.mxu0 }
 0x125   :  { %v1165_v10 = vadd.f32 %v1164_v7, %v1163_v2  ;;  %v686_v13 = vadd.f32 %v685_v59, %v637_v4 }
 0x126   :  { %v1166_v11 = vpop.f32.mrf.mxu0 }
 0x127   :  { %v640_v14 = vadd.f32 %v1165_v10, %v591_v8  ;;  %v700_v22 = vmax.f32 %v686_v13, 0.0 }
 0x128   :  { %v1167_v16 = vpop.f32.mrf.mxu0 }
 0x129   :  { %v1168_v19 = vadd.f32 %v1167_v16, %v1166_v11  ;;  %v689_v20 = vadd.f32 %v688_v12, %v640_v14 }
 0x12a   :  { %v1169_v21 = vpop.f32.mrf.mxu0 }
 0x12b   :  { %v645_v23 = vadd.f32 %v1168_v19, %v596_v15  ;;  %v701_v24 = vmax.f32 %v689_v20, 0.0 }
 0x12c   :  { %v1170_v25 = vpop.f32.mrf.mxu0 }
 0x12d   :  { %v704_v27 = vpack.c.bf16 %v701_v24, %v700_v22  ;;  %v1171_v28 = vadd.f32 %v1170_v25, %v1169_v21  ;;  %v694_v29 = vadd.f32 %v1195_v53, %v645_v23  ;;  %v1062_v53 = vld [vmem:[%s1492_s6] ss:$0 sm:$0xff]  ;;  %s988_s6 = sshll.u32 %s1385_s4, 4  ;;  %s989_s6 = int_to_ptr.vmem [resolvable:$true] %s988_s6 }
 0x12e   :  { %s1353_s17 = scalar_lea.vmem %s989_s6, 256  ;;  %p1358_p11 = scmp.lt.s32.totalorder %s989_s6, %s989_s6 }
 0x12f   :  { %v648_v30 = vadd.f32 %v1171_v28, %v599_v26  ;;  %1213 = vmatprep.mubr.bf16.mxu1 %v704_v27  ;;  %v702_v32 = vmax.f32 %v694_v29, 0.0  ;;  %p1354_p10 = scmp.ne.s32.totalorder %s989_s6, %s1353_s17  ;;  %p1359_p12 = scmp.lt.s32.totalorder %s1353_s17, %s1353_s17 }
 0x131   :  { %v697_v31 = vadd.f32 %v1196_v3, %v648_v30  ;;  %p1360_p13 = por %p1359_p12, %p1358_p11 }
 0x133   :  { %v703_v33 = vmax.f32 %v697_v31, 0.0  ;;  %p1361_p0 = pnand %p1360_p13, %p1354_p10 }
 0x135   :  { %v705_v34 = vpack.c.bf16 %v703_v33, %v702_v32 }
 0x137   :  { %1214 = vmatmul.mubr.bf16.vlgmr.msra.gmra.mxu1 %v705_v34 }
 0x1f7   :  { %v1215_v38 = vpop.f32.mrf.mxu1 }
 0x1f8   :  { %v820_v44 = vadd.f32 %v1215_v38, %v1053_v40 }
 0x1f9   :  { %v811_v39 = vpop.f32.mrf.mxu1 }
 0x1fa   :  { %v812_v42 = vadd.f32 %v1053_v40, %v811_v39  ;;  %v828_v50 = vmax.f32 %v820_v44, 0.0 }
 0x1fb   :  { %v1216_v41 = vpop.f32.mrf.mxu1 }
 0x1fc   :  { %v823_v43 = vadd.f32 %v1216_v41, %v1053_v40  ;;  %v826_v48 = vmax.f32 %v812_v42, 0.0 }
 0x1fd   :  { %v814_v45 = vpop.f32.mrf.mxu1 }
 0x1fe   :  { %v815_v46 = vadd.f32 %v1053_v40, %v814_v45  ;;  %v829_v47 = vmax.f32 %v823_v43, 0.0 }
 0x200   :  { %v827_v49 = vmax.f32 %v815_v46, 0.0  ;;  %v831_v52 = vpack.c.bf16 %v829_v47, %v828_v50 }
 0x202   :  { %v830_v51 = vpack.c.bf16 %v827_v49, %v826_v48 }
 0x204   :  { %1225 = vmatprep.mubr.msk.bf16.mxu0 %vm871_vm1, %v830_v51 }
 0x205   :  { %1226 = vmatmul.mubr.msk.bf16.vlgmr.msra.gmra.mxu0 %vm871_vm1, %v831_v52 }
 0x2c5   :  { %v1227_v54 = vpop.f32.mrf.mxu0 }
 0x2c6   :  { %v921_v55 = vadd.f32 %v1227_v54, %v1062_v53 }
 0x2c7   :  { %v912_v56 = vpop.f32.mrf.mxu0 }
 0x2c8   :  { %v913_v57 = vadd.f32 %v1062_v53, %v912_v56  ;;  %931 = vmax.xlane.f32.xlu1 %v921_v55 }
 0x2c9   :  { %v1228_v58 = vpop.f32.mrf.mxu0 }
 0x2ca   :  { %v924_v59 = vadd.f32 %v1228_v58, %v1062_v53  ;;  %927 = vmax.xlane.f32.xlu0 %v913_v57 }
 0x2cb   :  { %v915_v60 = vpop.f32.mrf.mxu0 }
 0x2cc   :  { %v916_v61 = vadd.f32 %v1062_v53, %v915_v60  ;;  %933 = vmax.xlane.f32.xlu1 %v924_v59 }
 0x2ce   :  { %929 = vmax.xlane.f32.xlu0 %v916_v61 }
 0x351   :  { %v932_v62 = vpop.xlane.xlu1 %931 }
 0x352   :  { %v937_v63 = vsub.f32 %v921_v55, %v932_v62 }
 0x353   :  { %v928_v0 = vpop.xlane.xlu0 %927 }
 0x354   :  { %v935_v1 = vsub.f32 %v913_v57, %v928_v0  ;;  %v943_v4 = vmul.f32 1.442695, %v937_v63 }
 0x355   :  { %v934_v2 = vpop.xlane.xlu1 %933 }
 0x356   :  { %v939_v3 = vmul.f32 1.442695, %v935_v1  ;;  %v938_v6 = vsub.f32 %v924_v59, %v934_v2 }
 0x357   :  { %v930_v5 = vpop.xlane.xlu0 %929 }
 0x358   :  { %1297 = vpow2.f32 %v939_v3  ;;  %v936_v7 = vsub.f32 %v916_v61, %v930_v5  ;;  %v945_v9 = vmul.f32 1.442695, %v938_v6 }
 0x359   :  { %1299 = vpow2.f32 %v943_v4 }
 0x35a   :  { %v941_v8 = vmul.f32 1.442695, %v936_v7 }
 0x35c   :  { %1301 = vpow2.f32 %v941_v8 }
 0x35d   :  { %1303 = vpow2.f32 %v945_v9 }
 0x365   :  { %v1298_v10 = vpop.eup %1297 }
 0x366   :  { %947 = vadd.xlane.f32.xlu0 %v1298_v10  ;;  %v1300_v11 = vpop.eup %1299 }
 0x369   :  { %v1302_v12 = vpop.eup %1301 }
 0x36a   :  { %951 = vadd.xlane.f32.xlu0 %v1300_v11  ;;  %949 = vadd.xlane.f32.xlu1 %v1302_v12  ;;  %v1304_v13 = vpop.eup %1303 }
 0x36e   :  { %953 = vadd.xlane.f32.xlu1 %v1304_v13 }
 0x3ef   :  { %v948_v14 = vpop.xlane.xlu0 %947 }
 0x3f0   :  { %1305 = vrcp.f32 %v948_v14 }
 0x3f3   :  { %v950_v15 = vpop.xlane.xlu1 %949  ;;  %v952_v16 = vpop.xlane.xlu0 %951 }
 0x3f4   :  { %1307 = vrcp.f32 %v950_v15 }
 0x3f5   :  { %1309 = vrcp.f32 %v952_v16 }
 0x3f7   :  { %v954_v17 = vpop.xlane.xlu1 %953 }
 0x3f8   :  { %1311 = vrcp.f32 %v954_v17 }
 0x3fd   :  { %v1306_v18 = vpop.eup %1305 }
 0x3fe   :  { %v959_v20 = vmul.f32 %v1306_v18, %v1298_v10 }
 0x401   :  { %v1308_v19 = vpop.eup %1307 }
 0x402   :  { %v960_v21 = vmul.f32 %v1308_v19, %v1302_v12  ;;  %v1310_v22 = vpop.eup %1309 }
 0x403   :  { %v961_v25 = vmul.f32 %v1310_v22, %v1300_v11 }
 0x404   :  { %v1080_v23 = vpack.c.bf16 %v960_v21, %v959_v20 }
 0x405   :  { %v1312_v24 = vpop.eup %1311 }
 0x406   :  { %v962_v26 = vmul.f32 %v1312_v24, %v1304_v13  ;;  %1081 = vst [vmem:[#allocation7] sm:$0xff] %v1080_v23  }
 0x408   :  { %v1085_v27 = vpack.c.bf16 %v962_v26, %v961_v25 }
 0x40a   :  { %1087 = vst [vmem:[#allocation7 + $0x8] sm:$0xff] %v1085_v27  }
 0x40b   :  { %1364 = shalt.err (!%p1361_p0)
}
 0x40c   :  { %994 = dma.vmem_to_hbm [thread:$0]  %s989_s6, 256, %s1493_s7, [#allocation4], %s1383_s11, %s1383_s11, %s1384_s12  }
 0x40d   :  { %1377 = dma.done.wait [#allocation4], 256  }
 0x40e   :  { %1378 = vsyncadd [#allocation4], 4294967040 }
 0x40f   :  { %998 = vsyncpa [#allocation3], 1 }
 0x410   :  { %999 = vsyncpa [#allocation6], 1 }
 0x411   :  { %1000 = vsyncpa [#allocation4], 1 }

</bundles_post_ra>
